<compile_context>
chip_gen: v7x
topology: tpu7x:2x2x1
jax: 0.10.0
libtpu: 0.0.40
codegen_flags: <defaults>
</compile_context>

<pallas_src>
import jax
import jax.numpy as jnp
from jax.experimental import pallas as pl
from jax.experimental.pallas import tpu as pltpu


# ----------------------------------------------------------------------------
# Kernel
# ----------------------------------------------------------------------------
def _res_kernel(xp_ref, yp_ref, wx_ref, wy_ref, b_ref, o_ref):
    """Packed, lane-dense forward for one batch tile.

    xp_ref/yp_ref : (tr, 8H)  -- row r holds 8 consecutive batch rows' features
    wx_ref/wy_ref : (8H, 8O)  -- kron(I8, W_half), block-diagonal
    b_ref         : (1, 8O)   -- bias tiled 8x, f32
    o_ref         : (tr, 8O)  -- packed output (reshapes back to (8*tr, O))
    """
    xf = xp_ref[...].astype(jnp.float32)
    yf = yp_ref[...].astype(jnp.float32)
    # LeakyReLU, PyTorch default negative_slope = 0.01 (f32 on the VPU).
    ax = jnp.where(xf > 0, xf, 0.01 * xf)
    ay = jnp.where(yf > 0, yf, 0.01 * yf)
    # cat((x, y), -1) @ W  ==  x @ W[:H] + y @ W[H:]  (exact), done in the
    # packed layout via the block-diagonal weights.  f32 accumulation.
    ax = ax.astype(wx_ref.dtype)
    ay = ay.astype(wy_ref.dtype)
    z = jnp.dot(ax, wx_ref[...], preferred_element_type=jnp.float32)
    z = z + jnp.dot(ay, wy_ref[...], preferred_element_type=jnp.float32)
    z = z + b_ref[...]                       # bias resident in VMEM, f32
    o_ref[...] = jnp.tanh(z).astype(o_ref.dtype)


# ----------------------------------------------------------------------------
# Tiling helpers
# ----------------------------------------------------------------------------
def _round_up(n, m):
    return -(-n // m) * m


def _max_tile_batch_rows():
    """Generation-aware cap on batch rows per grid step."""
    try:
        kind = jax.devices()[0].device_kind.lower()
    except Exception:
        kind = ""
    if "v5" in kind:
        return 2048
    if "v6" in kind:
        return 4096
    if "v7" in kind or "7x" in kind:
        return 8192
    return 4096


def _pick_tile_rows(R, tr_max):
    """Packed rows (8 batch rows each) per grid step.

    Aims for >= 4 grid steps (pipelining + v7x megacore) while keeping each
    step's DMA big enough to amortize the ~0.35us fixed per-step cost."""
    if R <= 64:
        return R                          # single full-extent tile (always legal)
    tr = pl.cdiv(R, 4)                    # >= 4 grid steps when possible
    tr = max(64, min(tr, tr_max))         # floor: 512 batch rows (~160+ KB/step)
    tr = _round_up(tr, 8)                 # sublane alignment for the block
    if tr >= R:
        return R
    return tr


# ----------------------------------------------------------------------------
# Wrappers
# ----------------------------------------------------------------------------
def res_forward_pallas(x, y, w, b, *, tile_rows=None):
    """tanh(leaky_relu(cat(x, y, -1)) @ w + b) via a lane-dense Pallas kernel.

    x, y : [B, H]
    w    : [2H, O]  Linear weight, pre-transposed (PyTorch stores [O, 2H])
    b    : [O]
    """
    B, H = x.shape
    twoH, O = w.shape
    assert twoH == 2 * H and y.shape == (B, H) and b.shape == (O,)

    # Pad the batch to a multiple of 8 so the free row-major view
    # [B, H] -> [B/8, 8H] (8 batch rows per packed row) is exact.
    pad = (-B) % 8
    if pad:
        x = jnp.pad(x, ((0, pad), (0, 0)))
        y = jnp.pad(y, ((0, pad), (0, 0)))
    Bp = B + pad
    R = Bp // 8

    # Lane-dense packed operands (reshapes of contiguous arrays are free views).
    xp = x.reshape(R, 8 * H)
    yp = y.reshape(R, 8 * H)
    eye8 = jnp.eye(8, dtype=w.dtype)
    wxp = jnp.kron(eye8, w[:H, :]).astype(x.dtype)        # [8H, 8O] block-diag
    wyp = jnp.kron(eye8, w[H:, :]).astype(x.dtype)        # [8H, 8O] block-diag
    bp = jnp.tile(b.astype(jnp.float32), 8).reshape(1, 8 * O)

    if tile_rows is None:
        tr = _pick_tile_rows(R, _max_tile_batch_rows() // 8)
    else:
        tr = max(1, min(int(tile_rows), R))
        if tr != R:
            tr = max(8, (tr // 8) * 8)     # keep sublane alignment
            if tr > R:
                tr = R
    grid = (pl.cdiv(R, tr),)

    out_packed = pl.pallas_call(
        _res_kernel,
        out_shape=jax.ShapeDtypeStruct((R, 8 * O), x.dtype),
        grid_spec=pltpu.PrefetchScalarGridSpec(
            num_scalar_prefetch=0,
            grid=grid,
            in_specs=[
                pl.BlockSpec((tr, 8 * H), lambda i: (i, 0)),      # x packed (pipelined)
                pl.BlockSpec((tr, 8 * H), lambda i: (i, 0)),      # y packed (pipelined)
                pl.BlockSpec((8 * H, 8 * O), lambda i: (0, 0)),   # W_x packed (resident)
                pl.BlockSpec((8 * H, 8 * O), lambda i: (0, 0)),   # W_y packed (resident)
                pl.BlockSpec((1, 8 * O), lambda i: (0, 0)),       # bias (resident)
            ],
            out_specs=pl.BlockSpec((tr, 8 * O), lambda i: (i, 0)),
        ),
        compiler_params=pltpu.CompilerParams(
            dimension_semantics=("parallel",),   # batch rows independent -> megacore
            vmem_limit_bytes=32 * 1024 * 1024,   # fits v7x's smaller VMEM budget
        ),
    )(xp, yp, wxp, wyp, bp)

    out = out_packed.reshape(Bp, O)              # free row-major view back to [B, O]
    return out[:B] if pad else out


def res_forward(x, y, w, b, *, tile_rows=None, min_pallas_batch=2048):
    """Dispatcher: small batches -> plain XLA fusion (dispatch + per-step
    overhead would dominate); large batches -> lane-dense Pallas kernel."""
    if x.shape[0] < min_pallas_batch:
        h = jnp.concatenate((x, y), axis=-1).astype(jnp.float32)
        a = jnp.where(h > 0, h, 0.01 * h)
        return jnp.tanh(a @ w.astype(jnp.float32) + b).astype(x.dtype)
    return res_forward_pallas(x, y, w, b, tile_rows=tile_rows)


def reference(x, y, w, b):
    h = jnp.concatenate(
        (x.astype(jnp.float32), y.astype(jnp.float32)), axis=-1)
    a = jnp.where(h > 0, h, 0.01 * h)
    return jnp.tanh(a @ w.astype(jnp.float32) + b.astype(jnp.float32))


def _check(name, got, want, atol, rtol):
    got32 = got.astype(jnp.float32)
    if not jnp.allclose(got32, want, atol=atol, rtol=rtol):
        err = float(jnp.max(jnp.abs(got32 - want)))
        raise AssertionError(f"{name}: max abs err {err}")


# ----------------------------------------------------------------------------
# Demo / self-test
# ----------------------------------------------------------------------------
if __name__ == "__main__":
    # Module-consistent feature sizes: hid_feats = 32, out_feats = 16
    # (in_feats / self.dec are unused in forward).
    HID, OUT = 32, 16
    key = jax.random.PRNGKey(0)
    kx, ky, kw, kb = jax.random.split(key, 4)

    # PyTorch-style Linear init: U(-1/sqrt(fan_in), 1/sqrt(fan_in)).
    fan_in = 2 * HID
    bound = 1.0 / (fan_in ** 0.5)
    w = jax.random.uniform(kw, (fan_in, OUT), minval=-bound, maxval=bound,
                           dtype=jnp.float32)
    b = jax.random.uniform(kb, (OUT,), minval=-bound, maxval=bound,
                           dtype=jnp.float32)

    # 1) f32, multi-step grid (tile_rows=32 packed rows -> 4 grid steps).
    B = 1024
    x = jax.random.normal(kx, (B, HID), dtype=jnp.float32)
    y = jax.random.normal(ky, (B, HID), dtype=jnp.float32)
    out = jax.block_until_ready(res_forward_pallas(x, y, w, b, tile_rows=32))
    assert out.shape == (B, OUT)
    _check("f32 multi-tile", out, reference(x, y, w, b), atol=1e-5, rtol=1e-5)

    # 2) f32, batch not a multiple of 8 (padding + partial last tile).
    Bo = 1000
    xo, yo = x[:Bo], y[:Bo]
    out_o = jax.block_until_ready(res_forward_pallas(xo, yo, w, b, tile_rows=32))
    assert out_o.shape == (Bo, OUT)
    _check("f32 padded", out_o, reference(xo, yo, w, b), atol=1e-5, rtol=1e-5)

    # 3) dispatcher, large batch -> Pallas path with auto (gen-aware) tiling.
    B2 = 2048
    x2 = jnp.concatenate([x, x], axis=0)
    y2 = jnp.concatenate([y, y], axis=0)
    out2 = jax.block_until_ready(res_forward(x2, y2, w, b))
    _check("f32 auto-tile", out2, reference(x2, y2, w, b), atol=1e-5, rtol=1e-5)

    # 4) dispatcher, tiny batch -> plain XLA fusion fallback.
    xs, ys = x[:8], y[:8]
    outs = jax.block_until_ready(res_forward(xs, ys, w, b))
    _check("tiny fallback", outs, reference(xs, ys, w, b), atol=1e-5, rtol=1e-5)

    # 5) bf16 I/O path (halves HBM traffic; f32 accumulation inside).
    xb = x.astype(jnp.bfloat16)
    yb = y.astype(jnp.bfloat16)
    out_b = jax.block_until_ready(res_forward_pallas(xb, yb, w, b, tile_rows=32))
    assert out_b.dtype == jnp.bfloat16
    _check("bf16", out_b, reference(xb, yb, w, b), atol=5e-2, rtol=5e-2)

    print("KERNEL_OK")
</pallas_src>

<mosaic_0001>
module attributes {stable_mosaic.version = 11 : i64} {
  func.func @_res_kernel(%arg0: i32, %arg1: memref<32x256xf32, #tpu.memory_space<vmem>>, %arg2: memref<32x256xf32, #tpu.memory_space<vmem>>, %arg3: memref<256x128xf32, #tpu.memory_space<vmem>>, %arg4: memref<256x128xf32, #tpu.memory_space<vmem>>, %arg5: memref<1x128xf32, #tpu.memory_space<vmem>>, %arg6: memref<32x128xf32, #tpu.memory_space<vmem>>) attributes {dimension_semantics = [#tpu.dimension_semantics<parallel>], iteration_bounds = array<i64: 4>, scalar_prefetch = 0 : i64, scratch_operands = 0 : i64, tpu.core_type = #tpu.core_type<tc>, window_params = [{transform_indices = @transform_0, window_bounds = array<i64: 32, 256>}, {transform_indices = @transform_1, window_bounds = array<i64: 32, 256>}, {pipeline_mode = #tpu.pipeline_mode<synchronous>, transform_indices = @transform_2, window_bounds = array<i64: 256, 128>}, {pipeline_mode = #tpu.pipeline_mode<synchronous>, transform_indices = @transform_3, window_bounds = array<i64: 256, 128>}, {pipeline_mode = #tpu.pipeline_mode<synchronous>, transform_indices = @transform_4, window_bounds = array<i64: 1, 128>}, {transform_indices = @transform_5, window_bounds = array<i64: 32, 128>}]} {
    %c0 = arith.constant 0 : index
    %c0_0 = arith.constant 0 : index
    %0 = vector.load %arg1[%c0, %c0_0] : memref<32x256xf32, #tpu.memory_space<vmem>>, vector<32x256xf32>
    %c0_1 = arith.constant 0 : index
    %c0_2 = arith.constant 0 : index
    %1 = vector.load %arg2[%c0_1, %c0_2] : memref<32x256xf32, #tpu.memory_space<vmem>>, vector<32x256xf32>
    %cst = arith.constant 0.000000e+00 : f32
    %2 = vector.broadcast %cst : f32 to vector<32x256xf32>
    %3 = arith.cmpf ogt, %0, %2 : vector<32x256xf32>
    %cst_3 = arith.constant 0.00999999977 : f32
    %4 = vector.broadcast %cst_3 : f32 to vector<32x256xf32>
    %5 = arith.mulf %4, %0 : vector<32x256xf32>
    %6 = arith.select %3, %0, %5 : vector<32x256xi1>, vector<32x256xf32>
    %cst_4 = arith.constant 0.000000e+00 : f32
    %7 = vector.broadcast %cst_4 : f32 to vector<32x256xf32>
    %8 = arith.cmpf ogt, %1, %7 : vector<32x256xf32>
    %cst_5 = arith.constant 0.00999999977 : f32
    %9 = vector.broadcast %cst_5 : f32 to vector<32x256xf32>
    %10 = arith.mulf %9, %1 : vector<32x256xf32>
    %11 = arith.select %8, %1, %10 : vector<32x256xi1>, vector<32x256xf32>
    %c0_6 = arith.constant 0 : index
    %c0_7 = arith.constant 0 : index
    %12 = vector.load %arg3[%c0_6, %c0_7] : memref<256x128xf32, #tpu.memory_space<vmem>>, vector<256x128xf32>
    %cst_8 = arith.constant dense<0.000000e+00> : vector<32x128xf32>
    %13 = tpu.matmul %6, %12, %cst_8 {dimension_numbers = #tpu.dot_dimension_numbers<[1], [0], [0], [1], [0, 0, 1, 1], [], []>} : vector<32x256xf32>, vector<256x128xf32>, vector<32x128xf32> -> vector<32x128xf32>
    %c0_9 = arith.constant 0 : index
    %c0_10 = arith.constant 0 : index
    %14 = vector.load %arg4[%c0_9, %c0_10] : memref<256x128xf32, #tpu.memory_space<vmem>>, vector<256x128xf32>
    %cst_11 = arith.constant dense<0.000000e+00> : vector<32x128xf32>
    %15 = tpu.matmul %11, %14, %cst_11 {dimension_numbers = #tpu.dot_dimension_numbers<[1], [0], [0], [1], [0, 0, 1, 1], [], []>} : vector<32x256xf32>, vector<256x128xf32>, vector<32x128xf32> -> vector<32x128xf32>
    %16 = arith.addf %13, %15 : vector<32x128xf32>
    %c0_12 = arith.constant 0 : index
    %c0_13 = arith.constant 0 : index
    %17 = vector.load %arg5[%c0_12, %c0_13] : memref<1x128xf32, #tpu.memory_space<vmem>>, vector<1x128xf32>
    %18 = vector.broadcast %17 : vector<1x128xf32> to vector<32x128xf32>
    %19 = arith.addf %16, %18 : vector<32x128xf32>
    %20 = math.tanh %19 : vector<32x128xf32>
    %c0_14 = arith.constant 0 : index
    %c0_15 = arith.constant 0 : index
    %21 = vector.load %arg6[%c0_14, %c0_15] : memref<32x128xf32, #tpu.memory_space<vmem>>, vector<32x128xf32>
    tpu.vector_store %arg6[%c0_14, %c0_15], %20 {strides = array<i32>} : memref<32x128xf32, #tpu.memory_space<vmem>>, vector<32x128xf32>,
    return
  }
  func.func @transform_0(%arg0: i32) -> (i32, i32) {
    %c0_i32 = arith.constant 0 : i32
    %c0_i32_0 = arith.constant 0 : i32
    return %arg0, %c0_i32 : i32, i32
  }
  func.func @transform_1(%arg0: i32) -> (i32, i32) {
    %c0_i32 = arith.constant 0 : i32
    %c0_i32_0 = arith.constant 0 : i32
    return %arg0, %c0_i32 : i32, i32
  }
  func.func @transform_2(%arg0: i32) -> (i32, i32) {
    %c0_i32 = arith.constant 0 : i32
    %c0_i32_0 = arith.constant 0 : i32
    %c0_i32_1 = arith.constant 0 : i32
    return %c0_i32, %c0_i32_0 : i32, i32
  }
  func.func @transform_3(%arg0: i32) -> (i32, i32) {
    %c0_i32 = arith.constant 0 : i32
    %c0_i32_0 = arith.constant 0 : i32
    %c0_i32_1 = arith.constant 0 : i32
    return %c0_i32, %c0_i32_0 : i32, i32
  }
  func.func @transform_4(%arg0: i32) -> (i32, i32) {
    %c0_i32 = arith.constant 0 : i32
    %c0_i32_0 = arith.constant 0 : i32
    %c0_i32_1 = arith.constant 0 : i32
    return %c0_i32, %c0_i32_0 : i32, i32
  }
  func.func @transform_5(%arg0: i32) -> (i32, i32) {
    %c0_i32 = arith.constant 0 : i32
    %c0_i32_0 = arith.constant 0 : i32
    return %arg0, %c0_i32 : i32, i32
  }
}

</mosaic_0001>

<bundles_post_ra>
// kernel: tpu_custom_call.1
= control target key start
LH: loop header
LB: loop body
LE: loop exit
PB: predicated region body
PF: predicated region fallthrough
CT: control target
= control target key end

     0   :  { %s1574_s0 = inlined_call_operand.hbm [shape: f32[128,256], index: 0, kind: input, shape index: {}]   ;;  %s1575_s1 = inlined_call_operand.hbm [shape: f32[128,256], index: 1, kind: input, shape index: {}]   ;;  %s1576_s2 = inlined_call_operand.hbm [shape: f32[256,128], index: 2, kind: input, shape index: {}]   ;;  %s1577_s3 = inlined_call_operand.hbm [shape: f32[256,128], index: 3, kind: input, shape index: {}]   ;;  %s1578_s4 = inlined_call_operand.vmem [shape: f32[1,128], index: 4, kind: input, shape index: {}]   ;;  %s1579_s5 = inlined_call_operand.hbm [shape: f32[128,128], index: 5, kind: output, shape index: {}]  }
   0x1   :  { %1583 = sst [smem:[#allocation16_spill]] %s1574_s0 }
   0x2   :  { %1584 = sst [smem:[#allocation17_spill]] %s1576_s2 }
   0x3   :  { %10 = vsyncpa [#allocation3], 0 }
   0x4   :  { %12 = vsyncpa [#allocation3 + $0x1], 0 }
   0x5   :  { %13 = vsyncpa [#allocation6], 0 }
   0x6   :  { %15 = vsyncpa [#allocation6 + $0x1], 0 }
   0x7   :  { %16 = vsyncpa [#allocation9], 0 }
   0x8   :  { %17 = vsyncpa [#allocation4], 0 }
   0x9   :  { %19 = vsyncpa [#allocation4 + $0x1], 0  ;;  %s1268_s18 = smov 0   ;;  %s1270_s19 = smov 0  }
   0xa   :  { %s1272_s20 = smov 0   ;;  %s1274_s21 = smov 0  }
   0xb LB: > { %s1289_s22 = sadd.s32 4294967295, %s1225_s21   ;;  %s763_s23 = sadd.s32 4294967294, %s1225_s21   ;;  %s1225_s21 = sphi %s1274_s21, %s1604_s21   ;;  %s1221_s20 = sphi %s1272_s20, %s1603_s20   ;;  %s1217_s19 = sphi %s1270_s19, %s1602_s19   ;;  %s1213_s18 = sphi %s1268_s18, %s1601_s18  }
   0xc   : > { %p45_p0 = scmp.ne.s32.totalorder %s1217_s19, %s1213_s18  ;;  %p1580_p1 = scmp.eq.s32.totalorder %s1289_s22, 0 }
   0xd   : > { %p164_p3 = scmp.eq.s32.totalorder %s763_s23, 3  ;;  %p764_p5 = scmp.ge.s32.totalorder %s1225_s21, 1 }
   0xe   : > { %p1298_p4 = por %p1580_p1, %p45_p0  ;;  %p171_p7 = scmp.lt.s32.totalorder %s1225_s21, 5 }
   0xf   : > { %p1303_p6 = por %p164_p3, %p45_p0  ;;  %s1227_s27 = smov [#allocation7]  }
  0x10   : > { %s1585_s24 = scalar_select %p1298_p4, 1, 0 }
  0x11   : > { %s1586_s25 = scalar_select %p1303_p6, 1, 0 }
  0x12   : > { %p1308_p8 = pnand %p764_p5, %p171_p7  ;;  %s183_s28 = sshll.u32 %s1227_s27, 4  ;;  %s184_s28 = int_to_ptr.vmem [resolvable:$true] %s183_s28 }
  0x13   : > { %s1228_s30 = smov [#allocation8]   ;;  %s1589_s2 = sld [smem:[#allocation17_spill]] }
  0x14   : > { %s1587_s26 = scalar_select %p1308_p8, 1, 0 }
  0x15   : > { %p959_p9 = pneg %p1308_p8  ;;  %s196_s6 = sshll.u32 %s1228_s30, 4  ;;  %s1320_s6 = int_to_ptr.vmem [resolvable:$true] %s196_s6 }
  0x17   : > { %p1316_p10 = pnand %p959_p9, %p1580_p1 }
  0x19   : > { %s1031_s9 = scalar_lea.hbm %s1589_s2, 4096  ;;  %p1033_p12 = pneg %p1316_p10 }
  0x1a   : > { %p1032_p11 = scmp.ne.s32.totalorder %s1589_s2, %s1031_s9  ;;  %p1038_p3 = scmp.lt.u32.totalorder %s1031_s9, %s1589_s2 }
  0x1c   : > { %p1034_p13 = pnand %p1033_p12, %p1032_p11 }
  0x1e   : > { %p1035_p0 = pneg %p1034_p13 }
  0x20   : > { %p1040_p5 = pnand %p1038_p3, %p1035_p0 }
  0x22   : > { %1043 = shalt.err (!%p1040_p5)
}
  0x23   : > { %s1044_s14 = scalar_lea.vmem %s184_s28, 4096  ;;  %p1052_p2 = scmp.lt.s32.totalorder %s184_s28, %s184_s28 }
  0x24   : > { %p1045_p7 = scmp.ne.s32.totalorder %s184_s28, %s1044_s14  ;;  %p1053_p6 = scmp.lt.s32.totalorder %s1044_s14, %s1044_s14 }
  0x26   : > { %p1047_p9 = pnand %p1045_p7, %p1033_p12  ;;  %p1054_p4 = por %p1053_p6, %p1052_p2 }
  0x28   : > { %p1048_p1 = pneg %p1047_p9 }
  0x2a   : > { %p1055_p8 = pnand %p1054_p4, %p1048_p1 }
  0x2c   : > { %1058 = shalt.err (!%p1055_p8)
}
  0x2d   : > { %s1229_s15 = smov 128   ;;  %s1230_s16 = smov 8  }
  0x2e   : > { %962 = dma.hbm_to_vmem [thread:$0]  (!%p1316_p10), %s1589_s2, 4096, %s184_s28, [#allocation6], %s1229_s15, %s1229_s15, %s1230_s16  }
  0x2f   : > { %s1059_s7 = scalar_lea.hbm %s1577_s3, 4096 }
  0x30   : > { %p1060_p11 = scmp.ne.s32.totalorder %s1577_s3, %s1059_s7  ;;  %p1066_p4 = scmp.lt.u32.totalorder %s1059_s7, %s1577_s3 }
  0x32   : > { %p1062_p1 = pnand %p1060_p11, %p1033_p12 }
  0x34   : > { %p1063_p2 = pneg %p1062_p1 }
  0x36   : > { %p1068_p6 = pnand %p1066_p4, %p1063_p2 }
  0x38   : > { %1071 = shalt.err (!%p1068_p6)
}
  0x39   : > { %s1072_s28 = scalar_lea.vmem %s1320_s6, 4096  ;;  %p1080_p3 = scmp.lt.s32.totalorder %s1320_s6, %s1320_s6 }
  0x3a   : > { %p1073_p8 = scmp.ne.s32.totalorder %s1320_s6, %s1072_s28  ;;  %p1081_p5 = scmp.lt.s32.totalorder %s1072_s28, %s1072_s28 }
  0x3c   : > { %p1075_p13 = pnand %p1073_p8, %p1033_p12  ;;  %p1082_p7 = por %p1081_p5, %p1080_p3 }
  0x3e   : > { %p1076_p0 = pneg %p1075_p13 }
  0x40   : > { %p1083_p9 = pnand %p1082_p7, %p1076_p0 }
  0x42   : > { %1086 = shalt.err (!%p1083_p9)
}
  0x43   : > { %965 = dma.hbm_to_vmem [thread:$0]  (!%p1316_p10), %s1577_s3, 4096, %s1320_s6, [#allocation9], %s1229_s15, %s1229_s15, %s1230_s16  }
  0x44   : > { %s1370_s14 = sadd.s32 1, %s1225_s21   ;;  %s32_s29 = sadd.s32 1, %s1221_s20 }
  0x45   : > { %s29_s17 = ssub.s32 %s1225_s21, %s1370_s14  ;;  %p39_p12 = scmp.ne.s32.totalorder %s1221_s20, %s1217_s19 }
  0x46   : > { %p30_p11 = scmp.eq.s32.totalorder %s29_s17, 0  ;;  %p40_p1 = scmp.eq.s32.totalorder %s1225_s21, 0 }
  0x47   : > { %p1590_p2 = scmp.eq.s32.totalorder %s1289_s22, 3  ;;  %p979_p6 = scmp.lt.s32.totalorder %s1225_s21, 4 }
  0x48   : > { %s1386_s27 = scalar_select %p30_p11, %s1221_s20, %s32_s29  }
  0x49   : > { %p1380_p4 = por %p1590_p2, %p39_p12  ;;  %p41_p8 = por %p40_p1, %p39_p12 }
  0x4a   : > { %s213_s30 = sand.u32 1, %s1221_s20   ;;  %s789_s6 = sshll.u32 %s1225_s21, 10 }
  0x4b   : > { %s1389_s7 = sshll.u32 %s213_s30, 6  ;;  %s1592_s0 = sld [smem:[#allocation16_spill]] }
  0x4c   : > { %s217_s9 = scalar_lea.vmem [#allocation2], %s1389_s7  ;;  %p1402_p10 = pnand %p979_p6, %p41_p8 }
  0x4d   : > { %s225_s10 = sshll.u32 %s217_s9, 4  ;;  %s1406_s28 = scalar_lea.sflag [#allocation3], %s213_s30  ;;  %s1400_s10 = int_to_ptr.vmem [resolvable:$true] %s225_s10 }
  0x4e   : > { %p1089_p0 = pneg %p1402_p10 }
  0x51   : > { %s1397_s8 = scalar_lea.hbm %s1592_s0, %s789_s6  ;;  %s1092_s17 = scalar_lea.hbm %s1592_s0, 4096 }
  0x52   : > { %s1087_s12 = scalar_lea.hbm %s1397_s8, 1024  ;;  %p1093_p7 = scmp.lt.u32.totalorder %s1397_s8, %s1592_s0 }
  0x53   : > { %p1088_p13 = scmp.ne.s32.totalorder %s1397_s8, %s1087_s12  ;;  %p1094_p9 = scmp.lt.u32.totalorder %s1092_s17, %s1087_s12 }
  0x54   : > { %p1096_p11 = scmp.lt.u32.totalorder %s1087_s12, %s1397_s8 }
  0x55   : > { %p1090_p3 = pnand %p1089_p0, %p1088_p13  ;;  %p1095_p12 = por %p1094_p9, %p1093_p7 }
  0x57   : > { %p1091_p5 = pneg %p1090_p3  ;;  %p1097_p1 = por %p1096_p11, %p1095_p12 }
  0x59   : > { %p1098_p2 = pnand %p1097_p1, %p1091_p5 }
  0x5b   : > { %1101 = shalt.err (!%p1098_p2)
}
  0x5c   : > { %s1102_s30 = scalar_lea.vmem %s1400_s10, 1024  ;;  %s1231_s9 = smov [#allocation2]  }
  0x5d   : > { %p1103_p6 = scmp.ne.s32.totalorder %s1400_s10, %s1102_s30  ;;  %s1107_s13 = sshll.u32 %s1231_s9, 4  ;;  %s1108_s13 = int_to_ptr.vmem [resolvable:$false] %s1107_s13 }
  0x5e   : > { %s1109_s29 = scalar_lea.vmem %s1108_s13, 2048  ;;  %p1110_p3 = scmp.lt.s32.totalorder %s1400_s10, %s1108_s13 }
  0x5f   : > { %p1105_p8 = pnand %p1103_p6, %p1089_p0  ;;  %p1111_p7 = scmp.lt.s32.totalorder %s1109_s29, %s1102_s30 }
  0x61   : > { %p1106_p13 = pneg %p1105_p8  ;;  %p1112_p9 = por %p1111_p7, %p1110_p3 }
  0x63   : > { %p1113_p12 = pnand %p1112_p9, %p1106_p13 }
  0x65   : > { %1116 = shalt.err (!%p1113_p12)
}
  0x66   : > { %s1232_s12 = smov 256   ;;  %s1233_s17 = smov 16  }
  0x67   : > { %969 = dma.hbm_to_vmem [thread:$0]  (!%p1402_p10), %s1397_s8, 1024, %s1400_s10, %s1406_s28, %s1232_s12, %s1232_s12, %s1233_s17  }
  0x68   : > { %s1442_s30 = scalar_lea.hbm %s1575_s1, %s789_s6  ;;  %s239_s9 = scalar_lea.vmem [#allocation5], %s1389_s7 }
  0x69   : > { %s247_s13 = sshll.u32 %s239_s9, 4  ;;  %s235_s29 = sand.u32 1, %s1225_s21   ;;  %s1445_s13 = int_to_ptr.vmem [resolvable:$true] %s247_s13 }
  0x6a   : > { %s1448_s0 = scalar_lea.sflag [#allocation6], %s235_s29  ;;  %s1117_s2 = scalar_lea.hbm %s1442_s30, 1024 }
  0x6b   : > { %p1118_p5 = scmp.ne.s32.totalorder %s1442_s30, %s1117_s2  ;;  %s1122_s10 = scalar_lea.hbm %s1575_s1, 4096 }
  0x6c   : > { %p1123_p2 = scmp.lt.u32.totalorder %s1442_s30, %s1575_s1  ;;  %p1124_p6 = scmp.lt.u32.totalorder %s1122_s10, %s1117_s2 }
  0x6d   : > { %p1120_p11 = pnand %p1118_p5, %p1089_p0  ;;  %p1126_p13 = scmp.lt.u32.totalorder %s1117_s2, %s1442_s30 }
  0x6e   : > { %p1125_p8 = por %p1124_p6, %p1123_p2 }
  0x6f   : > { %p1121_p1 = pneg %p1120_p11 }
  0x70   : > { %p1127_p3 = por %p1126_p13, %p1125_p8 }
  0x72   : > { %p1128_p7 = pnand %p1127_p3, %p1121_p1 }
  0x74   : > { %1131 = shalt.err (!%p1128_p7)
}
  0x75   : > { %s1132_s7 = scalar_lea.vmem %s1445_s13, 1024  ;;  %s1234_s16 = smov [#allocation5]  }
  0x76   : > { %p1133_p9 = scmp.ne.s32.totalorder %s1445_s13, %s1132_s7  ;;  %s1137_s9 = sshll.u32 %s1234_s16, 4  ;;  %s1138_s9 = int_to_ptr.vmem [resolvable:$false] %s1137_s9 }
  0x77   : > { %s1139_s29 = scalar_lea.vmem %s1138_s9, 2048  ;;  %p1140_p11 = scmp.lt.s32.totalorder %s1445_s13, %s1138_s9 }
  0x78   : > { %p1135_p12 = pnand %p1133_p9, %p1089_p0  ;;  %p1141_p2 = scmp.lt.s32.totalorder %s1139_s29, %s1132_s7 }
  0x7a   : > { %p1136_p5 = pneg %p1135_p12  ;;  %p1142_p6 = por %p1141_p2, %p1140_p11 }
  0x7c   : > { %p1143_p8 = pnand %p1142_p6, %p1136_p5 }
  0x7e   : > { %1146 = shalt.err (!%p1143_p8)
}
  0x7f   : > { %972 = dma.hbm_to_vmem [thread:$0]  (!%p1402_p10), %s1442_s30, 1024, %s1445_s13, %s1448_s0, %s1232_s12, %s1232_s12, %s1233_s17  }
  0x80   : > { %p1594_p0 = scmp.ne.s32.totalorder %s1587_s26, 0 }
  0x81   : > { %s1480_s2 = sand.u32 (!%p1594_p0), 1, %s1217_s19   ;;  %p1595_p1 = scmp.ne.s32.totalorder (!%p1594_p0), %s1585_s24, 0 }
  0x82   : > { %259 = sbr.rel (%p1594_p0) target bundleno = 441 (0x1b9), region = 40  ;;  %s777_s8 = sshll.u32 (!%p1594_p0), %s1480_s2, 6 }
  0x83   : > { %s262_s6 = scalar_lea.sflag (!%p1594_p0), [#allocation3], %s1480_s2  ;;  %s1484_s10 = scalar_lea.vmem (!%p1594_p0), [#allocation2], %s777_s8 }
  0x89   : > { %1192 = dma.done.wait (%p1595_p1), %s262_s6, 1024  }
  0x8a   : > { %1194 = vsyncadd (%p1595_p1), %s262_s6, 4294966272  ;;  %s270_s0 = sand.u32 1, %s1289_s22   ;;  %s1491_s11 = scalar_lea.vmem [#allocation5], %s777_s8 }
  0x8b   : > { %s271_s26 = scalar_lea.sflag [#allocation6], %s270_s0 }
  0x8c   : > { %1196 = dma.done.wait (%p1595_p1), %s271_s26, 1024  }
  0x8d   : > { %1198 = vsyncadd (%p1595_p1), %s271_s26, 4294966272  ;;  %p1596_p10 = scmp.eq.s32.totalorder %s1289_s22, 0 }
  0x8f   : > { %1200 = dma.done.wait (%p1596_p10), [#allocation6], 4096   ;;  %p1597_p13 = pmov %p1596_p10 }
  0x90   : > { %p1598_p3 = pmov %p1596_p10 }
  0x91   : > { %1202 = vsyncadd (%p1597_p13), [#allocation6], 4294963200 }
  0x92   : > { %1204 = dma.done.wait (%p1598_p3), [#allocation9], 4096   ;;  %p1599_p7 = pmov %p1598_p3 }
  0x93   : > { %v429_v0 = vld [vmem:[#allocation8 + $0x80] sm:$0xff]  ;;  %v430_v1 = vld [vmem:[#allocation8 + $0x88] sm:$0xff]  ;;  %v431_v11 = vld [vmem:[#allocation8 + $0x90] sm:$0xff]  ;;  %s781_s17 = sshll.u32 %s1480_s2, 5  ;;  %s792_s13 = sshll.u32 %s1289_s22, 9 }
  0x94   : > { %1206 = vsyncadd (%p1599_p7), [#allocation9], 4294963200  ;;  %v397_v2 = vld [vmem:[#allocation7 + $0x80] sm:$0xff]  ;;  %v881_v3 = vpack.c.bf16 %v430_v1, %v429_v0  ;;  %v398_v4 = vld [vmem:[#allocation7 + $0x88] sm:$0xff]  ;;  %s313_s30 = scalar_lea.vmem [#allocation10], %s781_s17  ;;  %s1529_s16 = scalar_lea.hbm %s1579_s5, %s792_s13 }
  0x95   : > { %v413_v5 = vld [vmem:[#allocation8] sm:$0xff]  ;;  %v414_v6 = vld [vmem:[#allocation8 + $0x8] sm:$0xff]  ;;  %v913_v7 = vpack.c.bf16 %v398_v4, %v397_v2  ;;  %v432_v13 = vld [vmem:[#allocation8 + $0x98] sm:$0xff]  ;;  %s648_s28 = sshll.u32 %s313_s30, 4  ;;  %s635_s9 = scalar_lea.sflag [#allocation4], %s1480_s2  ;;  %s1531_s28 = int_to_ptr.vmem [resolvable:$true] %s648_s28 }
  0x96   : > { %v883_v8 = vpack.c.bf16 %v414_v6, %v413_v5  ;;  %v381_v9 = vld [vmem:[#allocation7] sm:$0xff]  ;;  %v382_v10 = vld [vmem:[#allocation7 + $0x8] sm:$0xff]  ;;  %882 = vmatprep.subr.bf16.mxu0 %v881_v3  ;;  %v399_v14 = vld [vmem:[#allocation7 + $0x90] sm:$0xff]  ;;  %v885_v16 = vpack.c.bf16 %v432_v13, %v431_v11  ;;  %s1147_s29 = scalar_lea.vmem %s1531_s28, 512  ;;  %s1235_s22 = smov [#allocation10]  }
  0x97   : > { %v915_v12 = vpack.c.bf16 %v382_v10, %v381_v9  ;;  %v400_v15 = vld [vmem:[#allocation7 + $0x98] sm:$0xff]  ;;  %914 = vmatprep.subr.bf16.mxu1 %v913_v7  ;;  %v415_v18 = vld [vmem:[#allocation8 + $0x10] sm:$0xff]  ;;  %v433_v23 = vld [vmem:[#allocation8 + $0xa0] sm:$0xff]  ;;  %p1148_p9 = scmp.ne.s32.totalorder %s1531_s28, %s1147_s29  ;;  %s1151_s8 = sshll.u32 %s1235_s22, 4  ;;  %s1152_s8 = int_to_ptr.vmem [resolvable:$false] %s1151_s8 }
  0x98   : > { %884 = vmatpush3.bf16.msra.mxu0 %v883_v8  ;;  %v917_v17 = vpack.c.bf16 %v400_v15, %v399_v14  ;;  %v416_v19 = vld [vmem:[#allocation8 + $0x18] sm:$0xff]  ;;  %v383_v20 = vld [vmem:[#allocation7 + $0x10] sm:$0xff]  ;;  %v434_v24 = vld [vmem:[#allocation8 + $0xa8] sm:$0xff]  ;;  %s1153_s6 = scalar_lea.vmem %s1152_s8, 1024  ;;  %p1154_p11 = scmp.lt.s32.totalorder %s1531_s28, %s1152_s8 }
  0x99   : > { %916 = vmatpush3.bf16.msra.mxu1 %v915_v12  ;;  %v887_v21 = vpack.c.bf16 %v416_v19, %v415_v18  ;;  %v384_v22 = vld [vmem:[#allocation7 + $0x18] sm:$0xff]  ;;  %886 = vmatprep.subr.bf16.mxu0 %v885_v16  ;;  %v889_v26 = vpack.c.bf16 %v434_v24, %v433_v23  ;;  %v401_v27 = vld [vmem:[#allocation7 + $0xa0] sm:$0xff]  ;;  %v402_v28 = vld [vmem:[#allocation7 + $0xa8] sm:$0xff]  ;;  %p1149_p12 = pnand %p1148_p9, %p1380_p4  ;;  %p1155_p2 = scmp.lt.s32.totalorder %s1153_s6, %s1147_s29 }
  0x9a   : > { %918 = vmatprep.subr.bf16.mxu1 %v917_v17  ;;  %v919_v25 = vpack.c.bf16 %v384_v22, %v383_v20  ;;  %v417_v29 = vld [vmem:[#allocation8 + $0x20] sm:$0xff]  ;;  %v921_v30 = vpack.c.bf16 %v402_v28, %v401_v27  ;;  %v418_v31 = vld [vmem:[#allocation8 + $0x28] sm:$0xff]  ;;  %v435_v35 = vld [vmem:[#allocation8 + $0xb0] sm:$0xff] }
  0x9b   : > { %v385_v32 = vld [vmem:[#allocation7 + $0x20] sm:$0xff]  ;;  %v386_v33 = vld [vmem:[#allocation7 + $0x28] sm:$0xff]  ;;  %v891_v34 = vpack.c.bf16 %v418_v31, %v417_v29  ;;  %v436_v36 = vld [vmem:[#allocation8 + $0xb8] sm:$0xff]  ;;  %p1150_p5 = pneg %p1149_p12  ;;  %p1156_p6 = por %p1155_p2, %p1154_p11 }
  0x9c   : > { %888 = vmatpush3.bf16.msra.mxu0 %v887_v21  ;;  %v403_v37 = vld [vmem:[#allocation7 + $0xb0] sm:$0xff]  ;;  %v923_v38 = vpack.c.bf16 %v386_v33, %v385_v32  ;;  %v893_v39 = vpack.c.bf16 %v436_v36, %v435_v35  ;;  %v404_v40 = vld [vmem:[#allocation7 + $0xb8] sm:$0xff]  ;;  %v437_v46 = vld [vmem:[#allocation8 + $0xc0] sm:$0xff] }
  0x9d   : > { %920 = vmatpush3.bf16.msra.mxu1 %v919_v25  ;;  %890 = vmatprep.subr.bf16.mxu0 %v889_v26  ;;  %v419_v41 = vld [vmem:[#allocation8 + $0x30] sm:$0xff]  ;;  %v420_v42 = vld [vmem:[#allocation8 + $0x38] sm:$0xff]  ;;  %v925_v43 = vpack.c.bf16 %v404_v40, %v403_v37  ;;  %v438_v47 = vld [vmem:[#allocation8 + $0xc8] sm:$0xff]  ;;  %p1157_p8 = pnand %p1156_p6, %p1150_p5 }
  0x9e   : > { %922 = vmatprep.subr.bf16.mxu1 %v921_v30  ;;  %v387_v44 = vld [vmem:[#allocation7 + $0x30] sm:$0xff]  ;;  %v388_v45 = vld [vmem:[#allocation7 + $0x38] sm:$0xff]  ;;  %v405_v48 = vld [vmem:[#allocation7 + $0xc0] sm:$0xff]  ;;  %v895_v50 = vpack.c.bf16 %v420_v42, %v419_v41  ;;  %v897_v52 = vpack.c.bf16 %v438_v47, %v437_v46 }
  0x9f   : > { %v406_v49 = vld [vmem:[#allocation7 + $0xc8] sm:$0xff]  ;;  %v927_v51 = vpack.c.bf16 %v388_v45, %v387_v44  ;;  %v421_v53 = vld [vmem:[#allocation8 + $0x40] sm:$0xff]  ;;  %v439_v58 = vld [vmem:[#allocation8 + $0xd0] sm:$0xff] }
  0xa0   : > { %892 = vmatpush3.bf16.msra.mxu0 %v891_v34  ;;  %v422_v54 = vld [vmem:[#allocation8 + $0x48] sm:$0xff]  ;;  %v389_v55 = vld [vmem:[#allocation7 + $0x40] sm:$0xff]  ;;  %v929_v56 = vpack.c.bf16 %v406_v49, %v405_v48  ;;  %v440_v59 = vld [vmem:[#allocation8 + $0xd8] sm:$0xff] }
  0xa1   : > { %924 = vmatpush3.bf16.msra.mxu1 %v923_v38  ;;  %894 = vmatprep.subr.bf16.mxu0 %v893_v39  ;;  %v390_v57 = vld [vmem:[#allocation7 + $0x48] sm:$0xff]  ;;  %v407_v60 = vld [vmem:[#allocation7 + $0xd0] sm:$0xff]  ;;  %v408_v61 = vld [vmem:[#allocation7 + $0xd8] sm:$0xff]  ;;  %v899_v62 = vpack.c.bf16 %v422_v54, %v421_v53  ;;  %v901_v0 = vpack.c.bf16 %v440_v59, %v439_v58 }
  0xa2   : > { %926 = vmatprep.subr.bf16.mxu1 %v925_v43  ;;  %v931_v63 = vpack.c.bf16 %v390_v57, %v389_v55  ;;  %v423_v1 = vld [vmem:[#allocation8 + $0x50] sm:$0xff]  ;;  %v424_v2 = vld [vmem:[#allocation8 + $0x58] sm:$0xff]  ;;  %v933_v4 = vpack.c.bf16 %v408_v61, %v407_v60  ;;  %v441_v6 = vld [vmem:[#allocation8 + $0xe0] sm:$0xff] }
  0xa3   : > { %v391_v3 = vld [vmem:[#allocation7 + $0x50] sm:$0xff]  ;;  %v392_v5 = vld [vmem:[#allocation7 + $0x58] sm:$0xff]  ;;  %v442_v7 = vld [vmem:[#allocation8 + $0xe8] sm:$0xff]  ;;  %v903_v10 = vpack.c.bf16 %v424_v2, %v423_v1 }
  0xa4   : > { %896 = vmatpush3.bf16.msra.mxu0 %v895_v50  ;;  %v409_v8 = vld [vmem:[#allocation7 + $0xe0] sm:$0xff]  ;;  %v410_v9 = vld [vmem:[#allocation7 + $0xe8] sm:$0xff]  ;;  %v935_v14 = vpack.c.bf16 %v392_v5, %v391_v3  ;;  %v905_v15 = vpack.c.bf16 %v442_v7, %v441_v6  ;;  %v443_v20 = vld [vmem:[#allocation8 + $0xf0] sm:$0xff] }
  0xa5   : > { %928 = vmatpush3.bf16.msra.mxu1 %v927_v51  ;;  %898 = vmatprep.subr.bf16.mxu0 %v897_v52  ;;  %v425_v11 = vld [vmem:[#allocation8 + $0x60] sm:$0xff]  ;;  %v426_v12 = vld [vmem:[#allocation8 + $0x68] sm:$0xff]  ;;  %v937_v19 = vpack.c.bf16 %v410_v9, %v409_v8  ;;  %v444_v21 = vld [vmem:[#allocation8 + $0xf8] sm:$0xff] }
  0xa6   : > { %930 = vmatprep.subr.bf16.mxu1 %v929_v56  ;;  %v393_v13 = vld [vmem:[#allocation7 + $0x60] sm:$0xff]  ;;  %v394_v16 = vld [vmem:[#allocation7 + $0x68] sm:$0xff]  ;;  %v411_v23 = vld [vmem:[#allocation7 + $0xf0] sm:$0xff]  ;;  %v907_v26 = vpack.c.bf16 %v426_v12, %v425_v11  ;;  %v909_v30 = vpack.c.bf16 %v444_v21, %v443_v20 }
  0xa7   : > { %v326_v17 = vld [vmem:[%s1491_s11 + $0x8] sm:$0xff]  ;;  %v412_v24 = vld [vmem:[#allocation7 + $0xf8] sm:$0xff]  ;;  %v427_v27 = vld [vmem:[#allocation8 + $0x70] sm:$0xff]  ;;  %v939_v29 = vpack.c.bf16 %v394_v16, %v393_v13 }
  0xa8   : > { %900 = vmatpush3.bf16.msra.mxu0 %v899_v62  ;;  %v318_v18 = vld [vmem:[%s1484_s10 + $0x8] sm:$0xff]  ;;  %vm358_vm0 = vcmp.gt.f32.partialorder %v326_v17, 0.0  ;;  %v366_v22 = vmul.f32 0.01, %v326_v17  ;;  %v428_v31 = vld [vmem:[#allocation8 + $0x78] sm:$0xff]  ;;  %v325_v33 = vld [vmem:[%s1491_s11] sm:$0xff]  ;;  %v941_v35 = vpack.c.bf16 %v412_v24, %v411_v23 }
  0xa9   : > { %932 = vmatpush3.bf16.msra.mxu1 %v931_v63  ;;  %902 = vmatprep.subr.bf16.mxu0 %v901_v0  ;;  %vm334_vm1 = vcmp.gt.f32.partialorder %v318_v18, 0.0  ;;  %v342_v25 = vmul.f32 0.01, %v318_v18  ;;  %v317_v34 = vld [vmem:[%s1484_s10] sm:$0xff]  ;;  %v395_v36 = vld [vmem:[#allocation7 + $0x70] sm:$0xff]  ;;  %v396_v37 = vld [vmem:[#allocation7 + $0x78] sm:$0xff]  ;;  %v911_v40 = vpack.c.bf16 %v428_v31, %v427_v27 }
  0xaa   : > { %934 = vmatprep.subr.bf16.mxu1 %v933_v4  ;;  %v374_v28 = vsel %vm358_vm0, %v326_v17, %v366_v22  ;;  %v328_v38 = vld [vmem:[%s1491_s11 + $0x18] sm:$0xff]  ;;  %v365_v41 = vmul.f32 0.01, %v325_v33  ;;  %v341_v42 = vmul.f32 0.01, %v317_v34  ;;  %v943_v43 = vpack.c.bf16 %v396_v37, %v395_v36  ;;  %v327_v45 = vld [vmem:[%s1491_s11 + $0x10] sm:$0xff] }
  0xab   : > { %v350_v32 = vsel %vm334_vm1, %v318_v18, %v342_v25  ;;  %509 = vmatprep.mubr.f32.mxu0 %v374_v28  ;;  %v320_v39 = vld [vmem:[%s1484_s10 + $0x18] sm:$0xff]  ;;  %vm357_vm2 = vcmp.gt.f32.partialorder %v325_v33, 0.0  ;;  %vm333_vm3 = vcmp.gt.f32.partialorder %v317_v34, 0.0  ;;  %v368_v44 = vmul.f32 0.01, %v328_v38  ;;  %v319_v46 = vld [vmem:[%s1484_s10 + $0x10] sm:$0xff] }
  0xac   : > { %904 = vmatpush3.bf16.msra.mxu0 %v903_v10  ;;  %594 = vmatprep.mubr.f32.mxu1 %v350_v32  ;;  %vm360_vm4 = vcmp.gt.f32.partialorder %v328_v38, 0.0  ;;  %v344_v47 = vmul.f32 0.01, %v320_v39  ;;  %v330_v48 = vld [vmem:[%s1491_s11 + $0x28] sm:$0xff]  ;;  %vm336_vm5 = vcmp.gt.f32.partialorder %v320_v39, 0.0  ;;  %v373_v50 = vsel %vm357_vm2, %v325_v33, %v365_v41  ;;  %v329_v56 = vld [vmem:[%s1491_s11 + $0x20] sm:$0xff] }
  0xad   : > { %936 = vmatpush3.bf16.msra.mxu1 %v935_v14  ;;  %906 = vmatprep.subr.bf16.mxu0 %v905_v15  ;;  %v322_v49 = vld [vmem:[%s1484_s10 + $0x28] sm:$0xff]  ;;  %v349_v51 = vsel %vm333_vm3, %v317_v34, %v341_v42  ;;  %v367_v52 = vmul.f32 0.01, %v327_v45  ;;  %v343_v53 = vmul.f32 0.01, %v319_v46  ;;  %v376_v54 = vsel %vm360_vm4, %v328_v38, %v368_v44  ;;  %v321_v59 = vld [vmem:[%s1484_s10 + $0x20] sm:$0xff] }
  0xae   : > { %938 = vmatprep.subr.bf16.mxu1 %v937_v19  ;;  %vm359_vm6 = vcmp.gt.f32.partialorder %v327_v45, 0.0  ;;  %vm335_vm7 = vcmp.gt.f32.partialorder %v319_v46, 0.0  ;;  %v370_v55 = vmul.f32 0.01, %v330_v48  ;;  %v352_v57 = vsel %vm336_vm5, %v320_v39, %v344_v47  ;;  %v332_v60 = vld [vmem:[%s1491_s11 + $0x38] sm:$0xff]  ;;  %v331_v4 = vld [vmem:[%s1491_s11 + $0x30] sm:$0xff] }
  0xaf   : > { %vm362_vm8 = vcmp.gt.f32.partialorder %v330_v48, 0.0  ;;  %v346_v58 = vmul.f32 0.01, %v322_v49  ;;  %vm338_vm9 = vcmp.gt.f32.partialorder %v322_v49, 0.0  ;;  %v324_v61 = vld [vmem:[%s1484_s10 + $0x38] sm:$0xff]  ;;  %v375_v62 = vsel %vm359_vm6, %v327_v45, %v367_v52  ;;  %v323_v7 = vld [vmem:[%s1484_s10 + $0x30] sm:$0xff] }
  0xb0   : > { %908 = vmatpush3.bf16.msra.mxu0 %v907_v26  ;;  %v351_v63 = vsel %vm335_vm7, %v319_v46, %v343_v53  ;;  %v369_v0 = vmul.f32 0.01, %v329_v56  ;;  %v378_v1 = vsel %vm362_vm8, %v330_v48, %v370_v55  ;;  %vm361_vm10 = vcmp.gt.f32.partialorder %v329_v56, 0.0  ;;  %v782_v22 = vld [vmem:[%s1578_s4] ss:$0 sm:$0xff] }
  0xb1   : > { %940 = vmatpush3.bf16.msra.mxu1 %v939_v29  ;;  %910 = vmatprep.subr.bf16.mxu0 %v909_v30  ;;  %v345_v2 = vmul.f32 0.01, %v321_v59  ;;  %v372_v3 = vmul.f32 0.01, %v332_v60  ;;  %v354_v5 = vsel %vm338_vm9, %v322_v49, %v346_v58  ;;  %vm337_vm11 = vcmp.gt.f32.partialorder %v321_v59, 0.0 }
  0xb2   : > { %942 = vmatprep.subr.bf16.mxu1 %v941_v35  ;;  %vm364_vm12 = vcmp.gt.f32.partialorder %v332_v60, 0.0  ;;  %v348_v6 = vmul.f32 0.01, %v324_v61  ;;  %vm340_vm13 = vcmp.gt.f32.partialorder %v324_v61, 0.0  ;;  %v377_v8 = vsel %vm361_vm10, %v329_v56, %v369_v0 }
  0xb3   : > { %v371_v9 = vmul.f32 0.01, %v331_v4  ;;  %v353_v10 = vsel %vm337_vm11, %v321_v59, %v345_v2  ;;  %v380_v11 = vsel %vm364_vm12, %v332_v60, %v372_v3  ;;  %vm363_vm14 = vcmp.gt.f32.partialorder %v331_v4, 0.0 }
  0xb4   : > { %912 = vmatpush3.bf16.msra.mxu0 %v911_v40  ;;  %v347_v12 = vmul.f32 0.01, %v323_v7  ;;  %v356_v13 = vsel %vm340_vm13, %v324_v61, %v348_v6  ;;  %vm339_vm15 = vcmp.gt.f32.partialorder %v323_v7, 0.0 }
  0xb5   : > { %944 = vmatpush3.bf16.msra.mxu1 %v943_v43  ;;  %v379_v14 = vsel %vm363_vm14, %v331_v4, %v371_v9 }
  0xb6   : > { %v355_v15 = vsel %vm339_vm15, %v323_v7, %v347_v12 }
  0xb7   : > { %510 = vmatmul.mubr.f32.vlgmr.msra.gmra.mrb[0].mxu0 %v373_v50 }
  0xb8   : > { %595 = vmatmul.mubr.f32.vlgmr.msra.gmra.mrb[0].mxu1 %v349_v51  ;;  %514 = vmatprep.mubr.f32.mxu0 %v376_v54 }
  0xb9   : > { %599 = vmatprep.mubr.f32.mxu1 %v352_v57 }
  0xbb   : > { %515 = vmatmul.mubr.f32.gmra.mrb[2].mxu0 %v375_v62 }
  0xbc   : > { %600 = vmatmul.mubr.f32.gmra.mrb[2].mxu1 %v351_v63  ;;  %519 = vmatprep.mubr.f32.mxu0 %v378_v1 }
  0xbd   : > { %604 = vmatprep.mubr.f32.mxu1 %v354_v5 }
  0xbf   : > { %520 = vmatmul.mubr.f32.gmra.mrb[4].mxu0 %v377_v8 }
  0xc0   : > { %605 = vmatmul.mubr.f32.gmra.mrb[4].mxu1 %v353_v10  ;;  %524 = vmatprep.mubr.f32.mxu0 %v380_v11 }
  0xc1   : > { %609 = vmatprep.mubr.f32.mxu1 %v356_v13 }
  0xc3   : > { %525 = vmatmul.mubr.f32.gmra.mrb[6].mxu0 %v379_v14 }
  0xc4   : > { %610 = vmatmul.mubr.f32.gmra.mrb[6].mxu1 %v355_v15 }
 0x18a   : > { %v825_v16 = vpop.f32.mrb[0].mxu0 }
 0x18b   : > { %v869_v17 = vpop.f32.mrb[0].mxu1  ;;  %v826_v18 = vpop.f32.mrb[1].mxu0 }
 0x18c   : > { %v827_v19 = vadd.f32 %v826_v18, %v825_v16  ;;  %v870_v20 = vpop.f32.mrb[1].mxu1 }
 0x18d   : > { %v871_v21 = vadd.f32 %v870_v20, %v869_v17 }
 0x18e   : > { %v828_v23 = vpop.f32.mrb[2].mxu0 }
 0x18f   : > { %v597_v24 = vadd.f32 %v871_v21, %v827_v19  ;;  %v872_v25 = vpop.f32.mrb[2].mxu1  ;;  %v829_v26 = vpop.f32.mrb[3].mxu0 }
 0x190   : > { %v830_v27 = vadd.f32 %v829_v26, %v828_v23  ;;  %v873_v28 = vpop.f32.mrb[3].mxu1 }
 0x191   : > { %v622_v29 = vadd.f32 %v782_v22, %v597_v24  ;;  %v874_v30 = vadd.f32 %v873_v28, %v872_v25 }
 0x192   : > { %v831_v31 = vpop.f32.mrb[4].mxu0 }
 0x193   : > { %1023 = vtanh.f32 %v622_v29  ;;  %v602_v32 = vadd.f32 %v874_v30, %v830_v27  ;;  %v875_v33 = vpop.f32.mrb[4].mxu1  ;;  %v832_v34 = vpop.f32.mrb[5].mxu0 }
 0x194   : > { %v833_v35 = vadd.f32 %v832_v34, %v831_v31  ;;  %v876_v36 = vpop.f32.mrb[5].mxu1 }
 0x195   : > { %v623_v37 = vadd.f32 %v782_v22, %v602_v32  ;;  %v877_v38 = vadd.f32 %v876_v36, %v875_v33 }
 0x196   : > { %v834_v39 = vpop.f32.mrb[6].mxu0 }
 0x197   : > { %1025 = vtanh.f32 %v623_v37  ;;  %v607_v40 = vadd.f32 %v877_v38, %v833_v35  ;;  %v878_v41 = vpop.f32.mrb[6].mxu1  ;;  %v835_v42 = vpop.f32.mrb[7].mxu0 }
 0x198   : > { %v836_v43 = vadd.f32 %v835_v42, %v834_v39  ;;  %v879_v44 = vpop.f32.mrb[7].mxu1 }
 0x199   : > { %v624_v45 = vadd.f32 %v782_v22, %v607_v40  ;;  %v880_v46 = vadd.f32 %v879_v44, %v878_v41 }
 0x19b   : > { %1027 = vtanh.f32 %v624_v45  ;;  %v612_v47 = vadd.f32 %v880_v46, %v836_v43 }
 0x19d   : > { %v1024_v48 = vpop.eup %1023  ;;  %v625_v49 = vadd.f32 %v782_v22, %v612_v47 }
 0x19e   : > { %630 = vst [vmem:[%s313_s30] sm:$0xff] %v1024_v48 }
 0x19f   : > { %1029 = vtanh.f32 %v625_v49 }
 0x1a1   : > { %v1026_v50 = vpop.eup %1025 }
 0x1a2   : > { %631 = vst [vmem:[%s313_s30 + $0x8] sm:$0xff] %v1026_v50 }
 0x1a5   : > { %v1028_v51 = vpop.eup %1027 }
 0x1a6   : > { %632 = vst [vmem:[%s313_s30 + $0x10] sm:$0xff] %v1028_v51 }
 0x1a9   : > { %v1030_v52 = vpop.eup %1029 }
 0x1aa   : > { %633 = vst [vmem:[%s313_s30 + $0x18] sm:$0xff] %v1030_v52 }
 0x1ab   : > { %1160 = shalt.err (!%p1157_p8)
}
 0x1ac   : > { %s1161_s10 = scalar_lea.hbm %s1529_s16, 512  ;;  %s1165_s11 = scalar_lea.hbm %s1579_s5, 2048 }
 0x1ad   : > { %p1162_p0 = scmp.ne.s32.totalorder %s1529_s16, %s1161_s10  ;;  %p1166_p13 = scmp.lt.u32.totalorder %s1529_s16, %s1579_s5 }
 0x1ae   : > { %p1167_p3 = scmp.lt.u32.totalorder %s1165_s11, %s1161_s10  ;;  %p1169_p9 = scmp.lt.u32.totalorder %s1161_s10, %s1529_s16 }
 0x1af   : > { %p1163_p1 = pnand %p1162_p0, %p1380_p4 }
 0x1b0   : > { %p1168_p7 = por %p1167_p3, %p1166_p13 }
 0x1b1   : > { %p1164_p10 = pneg %p1163_p1 }
 0x1b2   : > { %p1170_p12 = por %p1169_p9, %p1168_p7 }
 0x1b4   : > { %p1171_p5 = pnand %p1170_p12, %p1164_p10 }
 0x1b6   : > { %1174 = shalt.err (!%p1171_p5)
}
 0x1b7   : > { %s1236_s17 = smov 128   ;;  %s1237_s30 = smov 8  }
 0x1b8   : > { %957 = dma.vmem_to_hbm [thread:$0]  (%p1380_p4), %s1531_s28, 512, %s1529_s16, %s635_s9, %s1236_s17, %s1236_s17, %s1237_s30  }
 0x1b9 PF: > { %p982_p11 = scmp.ge.s32.totalorder %s1225_s21, 2  ;;  %s663_s13 = sand.u32 1, %s1213_s18  }
 0x1ba   : > { %p1600_p2 = scmp.ne.s32.totalorder %s1586_s25, 0  ;;  %s664_s15 = scalar_lea.sflag [#allocation4], %s663_s13 }
 0x1bc   : > { %p974_p6 = pnand %p982_p11, %p1600_p2 }
 0x1be   : > { %1208 = dma.done.wait (!%p974_p6), %s664_s15, 512  }
 0x1bf   : > { %1210 = vsyncadd (!%p974_p6), %s664_s15, 4294966784  ;;  %p22_p8 = scmp.ge.s32.totalorder %s1370_s14, 6   ;;  %s1601_s18 = smov %s1217_s19 }
 0x1c0   : > { %s1602_s19 = smov %s1221_s20  ;;  %s1603_s20 = smov %s1386_s27 }
 0x1c1   : > { %s1604_s21 = smov %s1370_s14  ;;  %24 = sbr.rel (!%p22_p8) target bundleno = 11 (0xb), region = 106 }
 0x1c8   :  { %669 = vsyncpa [#allocation3], 1 }
 0x1c9   :  { %671 = vsyncpa [#allocation3 + $0x1], 1 }
 0x1ca   :  { %672 = vsyncpa [#allocation6], 1 }
 0x1cb   :  { %674 = vsyncpa [#allocation6 + $0x1], 1 }
 0x1cc   :  { %675 = vsyncpa [#allocation9], 1 }
 0x1cd   :  { %676 = vsyncpa [#allocation4], 1 }
 0x1ce   :  { %678 = vsyncpa [#allocation4 + $0x1], 1 }

</bundles_post_ra>
